<compile_context>
chip_gen: v7x
topology: tpu7x:2x2x1
jax: 0.10.0
libtpu: 0.0.40
codegen_flags: <defaults>
</compile_context>

<pallas_src>
import functools

import jax
import jax.numpy as jnp
from jax.experimental import pallas as pl
from jax.experimental.pallas import tpu as pltpu


def pixelcnn_kernel_filter(kernel_height, kernel_width, out_channels, in_channels,
                           horizontal, first_layer, blinded):
    """Gated-PixelCNN causal mask, same shape as W: (O, I, KH, KW)."""
    mask = jnp.ones((out_channels, in_channels, kernel_height, kernel_width),
                    jnp.float32)
    kh_c = kernel_height // 2
    kw_c = kernel_width // 2
    if horizontal:
        # horizontal stack: causal along width
        mask = mask.at[:, :, :, kw_c + 1:].set(0.0)
        if first_layer:
            # mask "A": current pixel excluded in the first layer
            mask = mask.at[:, :, :, kw_c].set(0.0)
    else:
        # vertical stack: only rows up to (optionally excluding) the center row
        mask = mask.at[:, :, kh_c + 1:, :].set(0.0)
        if blinded:
            mask = mask.at[:, :, kh_c, :].set(0.0)
    return mask


def _round_up(x, m):
    return ((x + m - 1) // m) * m


def _masked_conv_kernel(w_ref, b_ref, x_ref, o_ref, *, kh, kw, wp, tl):
    # w_ref: (KH*KW, Cout, Cin_p) bf16 -- per-tap masked weights (resident)
    # b_ref: (Cout, 1)            f32  -- bias (resident)
    # x_ref: (Cin_p, Lin_pad)     bf16 -- one padded image, spatially flattened
    # o_ref: (Cout, Lout_pad)     f32  -- "wide" output (valid rows, padded-width cols)
    cout, lout_pad = o_ref.shape
    n_taps = kh * kw
    w_taps = [w_ref[t] for t in range(n_taps)]          # (Cout, Cin_p) each
    bias = b_ref[...]                                    # (Cout, 1)

    # Static chunking: every offset below is a compile-time constant; output
    # chunk starts are multiples of 128 -> unmasked lane-dense stores.
    for c in range(lout_pad // tl):
        g0 = c * tl
        acc = jnp.zeros((cout, tl), jnp.float32)
        for t in range(n_taps):
            i, j = divmod(t, kw)
            # tap (i, j): contiguous shift of the flattened padded image
            x_tap = x_ref[:, pl.ds(g0 + i * wp + j, tl)]          # (Cin_p, tl)
            acc = acc + jnp.dot(w_taps[t], x_tap,
                                preferred_element_type=jnp.float32)
        o_ref[:, pl.ds(g0, tl)] = (acc + bias).astype(o_ref.dtype)


def masked_cnn_forward(x_nchw, w_oihw, bias, kernel_filter, stride=1, padding='same',
                       compute_dtype=jnp.bfloat16, lane_tile=2048):
    """Equivalent of MaskedCNN.forward: F.conv2d(x, W * mask, b, stride=1, 'same')."""
    assert stride == 1 and padding == 'same'
    N, Cin, H, W = x_nchw.shape
    Cout, _, KH, KW = w_oihw.shape

    # self.W.data *= self.kernel_filter   (idempotent: mask is 0/1)
    w_masked = w_oihw * kernel_filter

    # PyTorch 'same' padding (extra pad goes on bottom/right for even kernels).
    ph_l = (KH - 1) // 2
    ph_r = (KH - 1) - ph_l
    pw_l = (KW - 1) // 2
    pw_r = (KW - 1) - pw_l
    Hp = H + KH - 1
    Wp = W + KW - 1

    # Contraction (channel) dim padded to a multiple of 8 for clean MXU feed.
    Cin_p = _round_up(Cin, 8)

    # "Wide" output layout: valid rows, padded-width columns (g = h*Wp + w).
    # Tap (i,j) then reads the flat padded input at g + i*Wp + j -> contiguous.
    Lout = H * Wp
    TL = min(_round_up(lane_tile, 128), _round_up(Lout, 128))   # lane-dense chunk
    Lout_pad = pl.cdiv(Lout, TL) * TL
    max_off = (KH - 1) * Wp + (KW - 1)
    Lin_pad = _round_up(Lout_pad + max_off, 128)

    # Pad (spatial 'same' + channel), flatten spatial, pad flat tail, cast bf16.
    xp = jnp.pad(x_nchw, ((0, 0), (0, Cin_p - Cin), (ph_l, ph_r), (pw_l, pw_r)))
    x_flat = xp.reshape(N, Cin_p, Hp * Wp)
    x_flat = jnp.pad(x_flat, ((0, 0), (0, 0), (0, Lin_pad - Hp * Wp)))
    x_flat = x_flat.astype(compute_dtype)

    # Per-tap weights: (KH*KW, Cout, Cin_p), tap order t = i*KW + j.
    w_taps = jnp.transpose(w_masked, (2, 3, 0, 1))               # (KH, KW, Cout, Cin)
    w_taps = jnp.pad(w_taps, ((0, 0), (0, 0), (0, 0), (0, Cin_p - Cin)))
    w_taps = w_taps.reshape(KH * KW, Cout, Cin_p).astype(compute_dtype)

    b2 = bias.astype(jnp.float32).reshape(Cout, 1)

    # Explicit VMEM budget: double-buffered x/out blocks + resident weights/bias
    # + headroom.  Stays well inside 32 MiB scoped (and v7x's 64 MiB physical).
    xb = Cin_p * Lin_pad * 2
    ob = Cout * Lout_pad * 4
    wb = w_taps.size * 2
    bb = b2.size * 4
    vmem_limit = int(min(32 * 1024 * 1024,
                         max(8 * 1024 * 1024, 2 * (xb + ob) + wb + bb + 2 * 1024 * 1024)))

    flops = 2 * N * H * W * KH * KW * Cin * Cout
    bytes_accessed = (x_flat.size * x_flat.dtype.itemsize
                      + w_taps.size * w_taps.dtype.itemsize
                      + b2.size * b2.dtype.itemsize
                      + N * Cout * Lout_pad * 4)

    kernel = functools.partial(_masked_conv_kernel, kh=KH, kw=KW, wp=Wp, tl=TL)

    out_wide = pl.pallas_call(
        kernel,
        out_shape=jax.ShapeDtypeStruct((N, Cout, Lout_pad), jnp.float32),
        grid=(N,),
        in_specs=[
            pl.BlockSpec((KH * KW, Cout, Cin_p), lambda n: (0, 0, 0)),   # resident
            pl.BlockSpec((Cout, 1), lambda n: (0, 0)),                   # resident
            pl.BlockSpec((pl.Squeezed(), Cin_p, Lin_pad), lambda n: (n, 0, 0)),
        ],
        out_specs=pl.BlockSpec((pl.Squeezed(), Cout, Lout_pad), lambda n: (n, 0, 0)),
        compiler_params=pltpu.CompilerParams(
            dimension_semantics=("parallel",),
            vmem_limit_bytes=vmem_limit,
        ),
        cost_estimate=pl.CostEstimate(flops=flops, transcendentals=0,
                                      bytes_accessed=bytes_accessed),
    )(w_taps, b2, x_flat)

    # NCHW output: free reshape + small width slice (no transpose pass).
    out = out_wide[:, :, :Lout].reshape(N, Cout, H, Wp)[:, :, :, :W]
    return out


if __name__ == "__main__":
    # Module config: MaskedCNN(in_channels=4, out_channels=8, 3x3, stride=1,
    #                          padding='same', horizontal=False,
    #                          first_layer=True, blinded=False)
    N, Cin, Cout, H, W = 2, 4, 8, 16, 16
    KH = KW = 3

    key = jax.random.PRNGKey(0)
    k_w, k_x = jax.random.split(key)

    # Deterministic parameter init matching __init__:
    #   W = randn(O, I, KH, KW) * 0.1 ; b = zeros(O)
    W_param = 0.1 * jax.random.normal(k_w, (Cout, Cin, KH, KW), jnp.float32)
    b_param = jnp.zeros((Cout,), jnp.float32)
    mask = pixelcnn_kernel_filter(KH, KW, Cout, Cin,
                                  horizontal=False, first_layer=True, blinded=False)

    x = jax.random.normal(k_x, (N, Cin, H, W), jnp.float32)

    out = masked_cnn_forward(x, W_param, b_param, mask)
    out = jax.block_until_ready(out)
    assert out.shape == (N, Cout, H, W)

    # Reference: same bf16 quantization of operands, f32-accumulated XLA conv.
    # (Operand bf16 quantization is an intentional precision choice; padding
    #  'SAME' matches PyTorch 'same' for odd kernels.)
    w_q = (W_param * mask).astype(jnp.bfloat16).astype(jnp.float32)
    x_q = x.astype(jnp.bfloat16).astype(jnp.float32)
    ref = jax.lax.conv_general_dilated(
        x_q, w_q, window_strides=(1, 1), padding='SAME',
        dimension_numbers=('NCHW', 'OIHW', 'NCHW')) + b_param.reshape(1, Cout, 1, 1)
    assert jnp.allclose(out, ref, atol=1e-4, rtol=1e-4), "mismatch vs reference conv"

    print("KERNEL_OK")
</pallas_src>

<mosaic_0001>
module attributes {stable_mosaic.version = 11 : i64} {
  func.func @_masked_conv_kernel(%arg0: i32, %arg1: memref<9x8x8xbf16, #tpu.memory_space<vmem>>, %arg2: memref<8x1xf32, #tpu.memory_space<vmem>>, %arg3: memref<1x8x512xbf16, #tpu.memory_space<vmem>>, %arg4: memref<1x8x384xf32, #tpu.memory_space<vmem>>) attributes {dimension_semantics = [#tpu.dimension_semantics<parallel>], iteration_bounds = array<i64: 2>, scalar_prefetch = 0 : i64, scratch_operands = 0 : i64, tpu.core_type = #tpu.core_type<tc>, window_params = [{pipeline_mode = #tpu.pipeline_mode<synchronous>, transform_indices = @transform_0, window_bounds = array<i64: 9, 8, 8>}, {pipeline_mode = #tpu.pipeline_mode<synchronous>, transform_indices = @transform_1, window_bounds = array<i64: 8, 1>}, {transform_indices = @transform_2, window_bounds = array<i64: 1, 8, 512>}, {transform_indices = @transform_3, window_bounds = array<i64: 1, 8, 384>}]} {
    %c0 = arith.constant 0 : index
    %c0_0 = arith.constant 0 : index
    %c0_1 = arith.constant 0 : index
    %0 = vector.load %arg1[%c0, %c0_0, %c0_1] : memref<9x8x8xbf16, #tpu.memory_space<vmem>>, vector<1x8x8xbf16>
    %1 = vector.shape_cast %0 : vector<1x8x8xbf16> to vector<8x8xbf16>
    %c1 = arith.constant 1 : index
    %c0_2 = arith.constant 0 : index
    %c0_3 = arith.constant 0 : index
    %2 = vector.load %arg1[%c1, %c0_2, %c0_3] : memref<9x8x8xbf16, #tpu.memory_space<vmem>>, vector<1x8x8xbf16>
    %3 = vector.shape_cast %2 : vector<1x8x8xbf16> to vector<8x8xbf16>
    %c2 = arith.constant 2 : index
    %c0_4 = arith.constant 0 : index
    %c0_5 = arith.constant 0 : index
    %4 = vector.load %arg1[%c2, %c0_4, %c0_5] : memref<9x8x8xbf16, #tpu.memory_space<vmem>>, vector<1x8x8xbf16>
    %5 = vector.shape_cast %4 : vector<1x8x8xbf16> to vector<8x8xbf16>
    %c3 = arith.constant 3 : index
    %c0_6 = arith.constant 0 : index
    %c0_7 = arith.constant 0 : index
    %6 = vector.load %arg1[%c3, %c0_6, %c0_7] : memref<9x8x8xbf16, #tpu.memory_space<vmem>>, vector<1x8x8xbf16>
    %7 = vector.shape_cast %6 : vector<1x8x8xbf16> to vector<8x8xbf16>
    %c4 = arith.constant 4 : index
    %c0_8 = arith.constant 0 : index
    %c0_9 = arith.constant 0 : index
    %8 = vector.load %arg1[%c4, %c0_8, %c0_9] : memref<9x8x8xbf16, #tpu.memory_space<vmem>>, vector<1x8x8xbf16>
    %9 = vector.shape_cast %8 : vector<1x8x8xbf16> to vector<8x8xbf16>
    %c5 = arith.constant 5 : index
    %c0_10 = arith.constant 0 : index
    %c0_11 = arith.constant 0 : index
    %10 = vector.load %arg1[%c5, %c0_10, %c0_11] : memref<9x8x8xbf16, #tpu.memory_space<vmem>>, vector<1x8x8xbf16>
    %11 = vector.shape_cast %10 : vector<1x8x8xbf16> to vector<8x8xbf16>
    %c6 = arith.constant 6 : index
    %c0_12 = arith.constant 0 : index
    %c0_13 = arith.constant 0 : index
    %12 = vector.load %arg1[%c6, %c0_12, %c0_13] : memref<9x8x8xbf16, #tpu.memory_space<vmem>>, vector<1x8x8xbf16>
    %13 = vector.shape_cast %12 : vector<1x8x8xbf16> to vector<8x8xbf16>
    %c7 = arith.constant 7 : index
    %c0_14 = arith.constant 0 : index
    %c0_15 = arith.constant 0 : index
    %14 = vector.load %arg1[%c7, %c0_14, %c0_15] : memref<9x8x8xbf16, #tpu.memory_space<vmem>>, vector<1x8x8xbf16>
    %15 = vector.shape_cast %14 : vector<1x8x8xbf16> to vector<8x8xbf16>
    %c8 = arith.constant 8 : index
    %c0_16 = arith.constant 0 : index
    %c0_17 = arith.constant 0 : index
    %16 = vector.load %arg1[%c8, %c0_16, %c0_17] : memref<9x8x8xbf16, #tpu.memory_space<vmem>>, vector<1x8x8xbf16>
    %17 = vector.shape_cast %16 : vector<1x8x8xbf16> to vector<8x8xbf16>
    %c0_18 = arith.constant 0 : index
    %c0_19 = arith.constant 0 : index
    %18 = vector.load %arg2[%c0_18, %c0_19] : memref<8x1xf32, #tpu.memory_space<vmem>>, vector<8x1xf32>
    %cst = arith.constant 0.000000e+00 : f32
    %19 = vector.broadcast %cst : f32 to vector<8x384xf32>
    %c0_20 = arith.constant 0 : index
    %c0_21 = arith.constant 0 : index
    %c0_22 = arith.constant 0 : index
    %20 = vector.load %arg3[%c0_20, %c0_21, %c0_22] : memref<1x8x512xbf16, #tpu.memory_space<vmem>>, vector<1x8x384xbf16>
    %21 = vector.shape_cast %20 : vector<1x8x384xbf16> to vector<8x384xbf16>
    %cst_23 = arith.constant dense<0.000000e+00> : vector<8x384xf32>
    %22 = tpu.matmul %1, %21, %cst_23 {dimension_numbers = #tpu.dot_dimension_numbers<[1], [0], [0], [1], [0, 0, 1, 1], [], []>} : vector<8x8xbf16>, vector<8x384xbf16>, vector<8x384xf32> -> vector<8x384xf32>
    %23 = arith.addf %19, %22 : vector<8x384xf32>
    %c0_24 = arith.constant 0 : index
    %c0_25 = arith.constant 0 : index
    %c1_26 = arith.constant 1 : index
    %24 = vector.load %arg3[%c0_24, %c0_25, %c1_26] : memref<1x8x512xbf16, #tpu.memory_space<vmem>>, vector<1x8x384xbf16>
    %25 = vector.shape_cast %24 : vector<1x8x384xbf16> to vector<8x384xbf16>
    %cst_27 = arith.constant dense<0.000000e+00> : vector<8x384xf32>
    %26 = tpu.matmul %3, %25, %cst_27 {dimension_numbers = #tpu.dot_dimension_numbers<[1], [0], [0], [1], [0, 0, 1, 1], [], []>} : vector<8x8xbf16>, vector<8x384xbf16>, vector<8x384xf32> -> vector<8x384xf32>
    %27 = arith.addf %23, %26 : vector<8x384xf32>
    %c0_28 = arith.constant 0 : index
    %c0_29 = arith.constant 0 : index
    %c2_30 = arith.constant 2 : index
    %28 = vector.load %arg3[%c0_28, %c0_29, %c2_30] : memref<1x8x512xbf16, #tpu.memory_space<vmem>>, vector<1x8x384xbf16>
    %29 = vector.shape_cast %28 : vector<1x8x384xbf16> to vector<8x384xbf16>
    %cst_31 = arith.constant dense<0.000000e+00> : vector<8x384xf32>
    %30 = tpu.matmul %5, %29, %cst_31 {dimension_numbers = #tpu.dot_dimension_numbers<[1], [0], [0], [1], [0, 0, 1, 1], [], []>} : vector<8x8xbf16>, vector<8x384xbf16>, vector<8x384xf32> -> vector<8x384xf32>
    %31 = arith.addf %27, %30 : vector<8x384xf32>
    %c0_32 = arith.constant 0 : index
    %c0_33 = arith.constant 0 : index
    %c18 = arith.constant 18 : index
    %32 = vector.load %arg3[%c0_32, %c0_33, %c18] : memref<1x8x512xbf16, #tpu.memory_space<vmem>>, vector<1x8x384xbf16>
    %33 = vector.shape_cast %32 : vector<1x8x384xbf16> to vector<8x384xbf16>
    %cst_34 = arith.constant dense<0.000000e+00> : vector<8x384xf32>
    %34 = tpu.matmul %7, %33, %cst_34 {dimension_numbers = #tpu.dot_dimension_numbers<[1], [0], [0], [1], [0, 0, 1, 1], [], []>} : vector<8x8xbf16>, vector<8x384xbf16>, vector<8x384xf32> -> vector<8x384xf32>
    %35 = arith.addf %31, %34 : vector<8x384xf32>
    %c0_35 = arith.constant 0 : index
    %c0_36 = arith.constant 0 : index
    %c19 = arith.constant 19 : index
    %36 = vector.load %arg3[%c0_35, %c0_36, %c19] : memref<1x8x512xbf16, #tpu.memory_space<vmem>>, vector<1x8x384xbf16>
    %37 = vector.shape_cast %36 : vector<1x8x384xbf16> to vector<8x384xbf16>
    %cst_37 = arith.constant dense<0.000000e+00> : vector<8x384xf32>
    %38 = tpu.matmul %9, %37, %cst_37 {dimension_numbers = #tpu.dot_dimension_numbers<[1], [0], [0], [1], [0, 0, 1, 1], [], []>} : vector<8x8xbf16>, vector<8x384xbf16>, vector<8x384xf32> -> vector<8x384xf32>
    %39 = arith.addf %35, %38 : vector<8x384xf32>
    %c0_38 = arith.constant 0 : index
    %c0_39 = arith.constant 0 : index
    %c20 = arith.constant 20 : index
    %40 = vector.load %arg3[%c0_38, %c0_39, %c20] : memref<1x8x512xbf16, #tpu.memory_space<vmem>>, vector<1x8x384xbf16>
    %41 = vector.shape_cast %40 : vector<1x8x384xbf16> to vector<8x384xbf16>
    %cst_40 = arith.constant dense<0.000000e+00> : vector<8x384xf32>
    %42 = tpu.matmul %11, %41, %cst_40 {dimension_numbers = #tpu.dot_dimension_numbers<[1], [0], [0], [1], [0, 0, 1, 1], [], []>} : vector<8x8xbf16>, vector<8x384xbf16>, vector<8x384xf32> -> vector<8x384xf32>
    %43 = arith.addf %39, %42 : vector<8x384xf32>
    %c0_41 = arith.constant 0 : index
    %c0_42 = arith.constant 0 : index
    %c36 = arith.constant 36 : index
    %44 = vector.load %arg3[%c0_41, %c0_42, %c36] : memref<1x8x512xbf16, #tpu.memory_space<vmem>>, vector<1x8x384xbf16>
    %45 = vector.shape_cast %44 : vector<1x8x384xbf16> to vector<8x384xbf16>
    %cst_43 = arith.constant dense<0.000000e+00> : vector<8x384xf32>
    %46 = tpu.matmul %13, %45, %cst_43 {dimension_numbers = #tpu.dot_dimension_numbers<[1], [0], [0], [1], [0, 0, 1, 1], [], []>} : vector<8x8xbf16>, vector<8x384xbf16>, vector<8x384xf32> -> vector<8x384xf32>
    %47 = arith.addf %43, %46 : vector<8x384xf32>
    %c0_44 = arith.constant 0 : index
    %c0_45 = arith.constant 0 : index
    %c37 = arith.constant 37 : index
    %48 = vector.load %arg3[%c0_44, %c0_45, %c37] : memref<1x8x512xbf16, #tpu.memory_space<vmem>>, vector<1x8x384xbf16>
    %49 = vector.shape_cast %48 : vector<1x8x384xbf16> to vector<8x384xbf16>
    %cst_46 = arith.constant dense<0.000000e+00> : vector<8x384xf32>
    %50 = tpu.matmul %15, %49, %cst_46 {dimension_numbers = #tpu.dot_dimension_numbers<[1], [0], [0], [1], [0, 0, 1, 1], [], []>} : vector<8x8xbf16>, vector<8x384xbf16>, vector<8x384xf32> -> vector<8x384xf32>
    %51 = arith.addf %47, %50 : vector<8x384xf32>
    %c0_47 = arith.constant 0 : index
    %c0_48 = arith.constant 0 : index
    %c38 = arith.constant 38 : index
    %52 = vector.load %arg3[%c0_47, %c0_48, %c38] : memref<1x8x512xbf16, #tpu.memory_space<vmem>>, vector<1x8x384xbf16>
    %53 = vector.shape_cast %52 : vector<1x8x384xbf16> to vector<8x384xbf16>
    %cst_49 = arith.constant dense<0.000000e+00> : vector<8x384xf32>
    %54 = tpu.matmul %17, %53, %cst_49 {dimension_numbers = #tpu.dot_dimension_numbers<[1], [0], [0], [1], [0, 0, 1, 1], [], []>} : vector<8x8xbf16>, vector<8x384xbf16>, vector<8x384xf32> -> vector<8x384xf32>
    %55 = arith.addf %51, %54 : vector<8x384xf32>
    %56 = vector.broadcast %18 : vector<8x1xf32> to vector<8x384xf32>
    %57 = arith.addf %55, %56 : vector<8x384xf32>
    %c0_50 = arith.constant 0 : index
    %c0_51 = arith.constant 0 : index
    %c0_52 = arith.constant 0 : index
    %58 = vector.load %arg4[%c0_50, %c0_51, %c0_52] : memref<1x8x384xf32, #tpu.memory_space<vmem>>, vector<1x8x384xf32>
    %59 = vector.shape_cast %58 : vector<1x8x384xf32> to vector<8x384xf32>
    %60 = vector.shape_cast %57 : vector<8x384xf32> to vector<1x8x384xf32>
    tpu.vector_store %arg4[%c0_50, %c0_51, %c0_52], %60 {strides = array<i32>} : memref<1x8x384xf32, #tpu.memory_space<vmem>>, vector<1x8x384xf32>,
    return
  }
  func.func @transform_0(%arg0: i32) -> (i32, i32, i32) {
    %c0_i32 = arith.constant 0 : i32
    %c0_i32_0 = arith.constant 0 : i32
    %c0_i32_1 = arith.constant 0 : i32
    %c0_i32_2 = arith.constant 0 : i32
    return %c0_i32, %c0_i32_0, %c0_i32_1 : i32, i32, i32
  }
  func.func @transform_1(%arg0: i32) -> (i32, i32) {
    %c0_i32 = arith.constant 0 : i32
    %c0_i32_0 = arith.constant 0 : i32
    %c0_i32_1 = arith.constant 0 : i32
    return %c0_i32, %c0_i32_0 : i32, i32
  }
  func.func @transform_2(%arg0: i32) -> (i32, i32, i32) {
    %c0_i32 = arith.constant 0 : i32
    %c0_i32_0 = arith.constant 0 : i32
    %c0_i32_1 = arith.constant 0 : i32
    return %arg0, %c0_i32, %c0_i32_0 : i32, i32, i32
  }
  func.func @transform_3(%arg0: i32) -> (i32, i32, i32) {
    %c0_i32 = arith.constant 0 : i32
    %c0_i32_0 = arith.constant 0 : i32
    %c0_i32_1 = arith.constant 0 : i32
    return %arg0, %c0_i32, %c0_i32_0 : i32, i32, i32
  }
}

</mosaic_0001>

<bundles_post_ra>
// kernel: tpu_custom_call.1
= control target key start
LH: loop header
LB: loop body
LE: loop exit
PB: predicated region body
PF: predicated region fallthrough
CT: control target
= control target key end

     0   :  { %8 = vsyncpa [#allocation3], 0  ;;  %s1761_s0 = inlined_call_operand.vmem [shape: bf16[9,8,8], index: 0, kind: input, shape index: {}]   ;;  %s1762_s1 = inlined_call_operand.vmem [shape: f32[8,1], index: 1, kind: input, shape index: {}]   ;;  %s1763_s2 = inlined_call_operand.vmem [shape: bf16[2,8,512], index: 2, kind: input, shape index: {}]   ;;  %s1764_s3 = inlined_call_operand.hbm [shape: f32[2,8,384], index: 3, kind: output, shape index: {}]  }
   0x1   :  { %10 = vsyncpa [#allocation3 + $0x1], 0  ;;  %s1529_s12 = smov 0   ;;  %s1531_s13 = smov 0  }
   0x2   :  { %s1533_s14 = smov 0   ;;  %s1535_s15 = smov 0  }
   0x3 LB: > { %s1550_s16 = sadd.s32 4294967295, %s1495_s15   ;;  %s1251_s17 = sadd.s32 4294967294, %s1495_s15   ;;  %s1495_s15 = sphi %s1535_s15, %s1770_s15   ;;  %s1491_s14 = sphi %s1533_s14, %s1769_s14   ;;  %s1487_s13 = sphi %s1531_s13, %s1768_s13   ;;  %s1483_s12 = sphi %s1529_s12, %s1767_s12  }
   0x4   : > { %s1554_s18 = sadd.s32 1, %s1495_s15   ;;  %s91_s19 = sadd.s32 1, %s1491_s14 }
   0x5   : > { %s88_s20 = ssub.s32 %s1495_s15, %s1554_s18  ;;  %p101_p0 = scmp.ne.s32.totalorder %s1491_s14, %s1487_s13 }
   0x6   : > { %p89_p1 = scmp.eq.s32.totalorder %s88_s20, 0  ;;  %p102_p2 = scmp.eq.s32.totalorder %s1550_s16, 1 }
   0x7   : > { %p107_p3 = scmp.ne.s32.totalorder %s1487_s13, %s1483_s12  ;;  %p108_p4 = scmp.eq.s32.totalorder %s1251_s17, 1 }
   0x8   : > { %s1565_s21 = scalar_select %p89_p1, %s1491_s14, %s91_s19  }
   0x9   : > { %p1567_p5 = por %p102_p2, %p101_p0  ;;  %p1571_p6 = por %p108_p4, %p107_p3 }
   0xa   : > { %p1254_p7 = scmp.ge.s32.totalorder %s1495_s15, 1  ;;  %p140_p8 = scmp.lt.s32.totalorder %s1495_s15, 3 }
   0xc   : > { %p141_p9 = pnand %p1254_p7, %p140_p8 }
   0xd   : > { %p164_p10 = scmp.lt.s32.totalorder (!%p141_p9), %s1550_s16, 1  ;;  %v1497_v0 = vmov (!%p141_p9), 0.0   ;;  %v1498_v1 = vmov (!%p141_p9), 0   ;;  %vm1499_vm0 = vmmov (!%p141_p9), 0   ;;  %s1500_s29 = smov (!%p141_p9), 127   ;;  %v187_v8 = vld [vmem:[%s1762_s1] sm:$0xff] (!%p141_p9) }
   0xe   : > { %144 = sbr.rel (%p141_p9) target bundleno = 447 (0x1bf), region = 32  ;;  %1321 = vmatprep.subr.bf16.mxu1 (!%p141_p9), %v1497_v0  ;;  %260 = vmatprep.mubr.bf16.mxu0 (!%p141_p9), %v1498_v1  ;;  %s1501_s30 = smov (!%p141_p9), 126   ;;  %vm210_vm1 = vcmask (!%p141_p9), 1039360   ;;  %vm218_vm2 = vcmask (!%p141_p9), 1043456   ;;  %v1257_v19 = vld [vmem:[%s1761_s0 + $0x4] sm:$0xf] (!%p141_p9) }
   0xf   : > { %1323 = vmatprep.mubr.msk.bf16.mxu1 (!%p141_p9), %vm1499_vm0, %v1497_v0  ;;  %1427 = vset.pattern.permute.xlu0 (!%p141_p9), %v1498_v1  ;;  %s1502_s4 = smov (!%p141_p9), 110   ;;  %s1503_s5 = smov (!%p141_p9), 109   ;;  %vm214_vm3 = vcmask (!%p141_p9), 64512   ;;  %vm418_vm4 = vcmask (!%p141_p9), 1031168   ;;  %v170_v29 = vld [vmem:[%s1761_s0] sm:$0xf] (!%p141_p9) }
  0x10   : > { %s1504_s6 = smov (!%p141_p9), 108   ;;  %s1505_s7 = smov (!%p141_p9), 92   ;;  %vm526_vm5 = vcmask (!%p141_p9), 900096   ;;  %v1258_v39 = vld [vmem:[%s1761_s0 + $0x8] sm:$0xf] (!%p141_p9)  ;;  %vm634_vm6 = vcmask (!%p141_p9), 891904  }
  0x11   : > { %s1506_s8 = smov (!%p141_p9), 91   ;;  %s1507_s9 = smov (!%p141_p9), 90   ;;  %v1259_v49 = vld [vmem:[%s1761_s0 + $0xc] sm:$0xf] (!%p141_p9)  ;;  %vm742_vm7 = vcmask (!%p141_p9), 883712   ;;  %vm850_vm8 = vcmask (!%p141_p9), 752640  }
  0x12   : > { %v1260_v59 = vld [vmem:[%s1761_s0 + $0x10] sm:$0xf] (!%p141_p9)  ;;  %vm958_vm9 = vcmask (!%p141_p9), 744448   ;;  %vm1066_vm10 = vcmask (!%p141_p9), 736256   ;;  %s161_s17 = sand.u32 (!%p141_p9), 1, %s1487_s13   ;;  %s1376_s20 = smul.u32 (!%p141_p9), 384, %s1550_s16 }
  0x13   : > { %s1375_s19 = smul.u32 (!%p141_p9), 24, %s161_s17 }
  0x15   : > { %s165_s24 = scalar_select %p164_p10, %s1550_s16, 1 }
  0x16   : > { %s1717_s16 = scalar_lea.hbm %s1764_s3, %s1376_s20 }
  0x17   : > { %s1302_s25 = sshll.u32 %s165_s24, 4  ;;  %s163_s24 = scalar_lea.vmem [#allocation2], %s1375_s19 }
  0x18   : > { %s1587_s28 = scalar_lea.vmem %s1763_s2, %s1302_s25  ;;  %s1192_s25 = sshll.u32 %s163_s24, 4  ;;  %s1719_s25 = int_to_ptr.vmem [resolvable:$true] %s1192_s25 }
  0x19   : > { %v191_v2 = vld [vmem:[%s1587_s28 + $0x8] sm:$0xff]  ;;  %v190_v3 = vld [vmem:[%s1587_s28] sm:$0xff] }
  0x1a   : > { %v1267_v4 = vcombine.low %v191_v2, %v191_v2  ;;  %v1591_v5 = vcombine.low %v190_v3, %v190_v3  ;;  %v1268_v6 = vcombine.high %v191_v2, %v191_v2  ;;  %v1266_v7 = vcombine.high %v190_v3, %v190_v3  ;;  %v1432_v13 = vld [vmem:[%s1587_s28 + $0x8] ss:$0 sps:$4 sm:$0xff]   ;;  %s1178_s28 = scalar_lea.sflag [#allocation3], %s161_s17 }
  0x1b   : > { %v327_v23 = vsel %vm218_vm2, %v1432_v13, 0 }
  0x1c   : > { %206 = vrot.lane.b32.xlu1 %v1267_v4, %s1500_s29  ;;  %202 = vrot.lane.b32.xlu0 %v1591_v5, %s1500_s29  ;;  %v321_v21 = vsel %vm218_vm2, %v1591_v5, 0 }
  0x20   : > { %208 = vrot.lane.b32.xlu1 %v1268_v6, %s1500_s29  ;;  %204 = vrot.lane.b32.xlu0 %v1266_v7, %s1500_s29  ;;  %s1433_s29 = scalar_lea.vmem %s1719_s25, 384 }
  0x21   : > { %p1434_p11 = scmp.ne.s32.totalorder %s1719_s25, %s1433_s29 }
  0x23   : > { %p1435_p12 = pnand %p1434_p11, %p1567_p5 }
  0x24   : > { %410 = vrot.lane.b32.xlu0 %v1591_v5, %s1501_s30  ;;  %412 = vrot.lane.b32.xlu1 %v1266_v7, %s1501_s30 }
  0x25   : > { %p1436_p13 = pneg %p1435_p12 }
  0x28   : > { %414 = vrot.lane.b32.xlu0 %v1267_v4, %s1501_s30  ;;  %416 = vrot.lane.b32.xlu1 %v1268_v6, %s1501_s30  ;;  %s1508_s30 = smov [#allocation2]  }
  0x2c   : > { %518 = vrot.lane.b32.xlu0 %v1591_v5, %s1502_s4  ;;  %520 = vrot.lane.b32.xlu1 %v1266_v7, %s1502_s4 }
  0x30   : > { %522 = vrot.lane.b32.xlu0 %v1267_v4, %s1502_s4  ;;  %524 = vrot.lane.b32.xlu1 %v1268_v6, %s1502_s4  ;;  %s1437_s4 = sshll.u32 %s1508_s30, 4  ;;  %s1438_s4 = int_to_ptr.vmem [resolvable:$false] %s1437_s4 }
  0x31   : > { %p1440_p0 = scmp.lt.s32.totalorder %s1719_s25, %s1438_s4 }
  0x34   : > { %626 = vrot.lane.b32.xlu0 %v1591_v5, %s1503_s5  ;;  %628 = vrot.lane.b32.xlu1 %v1266_v7, %s1503_s5 }
  0x38   : > { %630 = vrot.lane.b32.xlu0 %v1267_v4, %s1503_s5  ;;  %632 = vrot.lane.b32.xlu1 %v1268_v6, %s1503_s5  ;;  %s1439_s5 = scalar_lea.vmem %s1438_s4, 768 }
  0x39   : > { %p1441_p1 = scmp.lt.s32.totalorder %s1439_s5, %s1433_s29 }
  0x3b   : > { %p1442_p2 = por %p1441_p1, %p1440_p0 }
  0x3c   : > { %734 = vrot.lane.b32.xlu0 %v1591_v5, %s1504_s6  ;;  %736 = vrot.lane.b32.xlu1 %v1266_v7, %s1504_s6 }
  0x3d   : > { %p1443_p3 = pnand %p1442_p2, %p1436_p13 }
  0x40   : > { %738 = vrot.lane.b32.xlu0 %v1267_v4, %s1504_s6  ;;  %740 = vrot.lane.b32.xlu1 %v1268_v6, %s1504_s6 }
  0x44   : > { %842 = vrot.lane.b32.xlu0 %v1591_v5, %s1505_s7  ;;  %844 = vrot.lane.b32.xlu1 %v1266_v7, %s1505_s7 }
  0x48   : > { %846 = vrot.lane.b32.xlu0 %v1267_v4, %s1505_s7  ;;  %848 = vrot.lane.b32.xlu1 %v1268_v6, %s1505_s7 }
  0x4c   : > { %950 = vrot.lane.b32.xlu0 %v1591_v5, %s1506_s8  ;;  %952 = vrot.lane.b32.xlu1 %v1266_v7, %s1506_s8 }
  0x50   : > { %954 = vrot.lane.b32.xlu0 %v1267_v4, %s1506_s8  ;;  %956 = vrot.lane.b32.xlu1 %v1268_v6, %s1506_s8 }
  0x54   : > { %1058 = vrot.lane.b32.xlu0 %v1591_v5, %s1507_s9  ;;  %1060 = vrot.lane.b32.xlu1 %v1266_v7, %s1507_s9 }
  0x58   : > { %1062 = vrot.lane.b32.xlu0 %v1267_v4, %s1507_s9  ;;  %1064 = vrot.lane.b32.xlu1 %v1268_v6, %s1507_s9 }
  0x5c   : > { %1168 = vperm.xlu0 %1427, %v187_v8  }
  0x8e   : > { %v207_v9 = vpop.permute.xlu1 %206  ;;  %v203_v10 = vpop.permute.xlu0 %202 }
  0x92   : > { %v209_v11 = vpop.permute.xlu1 %208  ;;  %v205_v12 = vpop.permute.xlu0 %204 }
  0x93   : > { %v212_v14 = vsel %vm210_vm1, %v205_v12, %v207_v9  ;;  %v211_v15 = vsel %vm210_vm1, %v203_v10, %v205_v12  ;;  %v213_v16 = vsel %vm210_vm1, %v207_v9, %v209_v11 }
  0x94   : > { %1269 = vmatprep.subr.msk.bf16.mxu0 %vm218_vm2, %v212_v14  ;;  %v220_v17 = vsel %vm218_vm2, %v211_v15, 0  ;;  %v226_v18 = vsel %vm218_vm2, %v213_v16, 0 }
  0x95   : > { %229 = vmatpush1.bf16.msra.mxu0 %v220_v17  ;;  %1322 = vmatpush3.bf16.msra.mxu1 %v226_v18  ;;  %v1262_v17 = vld [vmem:[%s1761_s0 + $0x18] sm:$0xf] }
  0x96   : > { %v411_v20 = vpop.permute.xlu0 %410  ;;  %1275 = vmatprep.subr.msk.bf16.mxu0 %vm218_vm2, %v1266_v7  ;;  %1327 = vmatprep.subr.bf16.mxu1 %v1497_v0  ;;  %v413_v22 = vpop.permute.xlu1 %412  ;;  %v1261_v7 = vld [vmem:[%s1761_s0 + $0x14] sm:$0xf] }
  0x97   : > { %v419_v26 = vsel %vm418_vm4, %v411_v20, %v413_v22 }
  0x98   : > { %1270 = vmatmul.mubr.msk.bf16.vlgmr.msra.gmra.mrb[0].mxu0 %vm214_vm3, %v1257_v19  ;;  %1324 = vmatmul.mubr.msk.bf16.vlgmr.msra.gmra.mrb[0].mxu1 %vm214_vm3, %v1257_v19  ;;  %v426_v30 = vsel %vm218_vm2, %v419_v26, 0 }
  0x99   : > { %330 = vmatpush1.bf16.msra.mxu0 %v321_v21  ;;  %1328 = vmatpush3.bf16.msra.mxu1 %v327_v23 }
  0x9a   : > { %v415_v24 = vpop.permute.xlu0 %414  ;;  %v417_v25 = vpop.permute.xlu1 %416  ;;  %361 = vmatprep.mubr.bf16.mxu0 %v1498_v1  ;;  %1329 = vmatprep.mubr.msk.bf16.mxu1 %vm1499_vm0, %v1497_v0 }
  0x9b   : > { %v420_v27 = vsel %vm418_vm4, %v413_v22, %v415_v24  ;;  %v421_v28 = vsel %vm418_vm4, %v415_v24, %v417_v25  ;;  %1333 = vmatprep.subr.bf16.mxu1 %v1497_v0 }
  0x9c   : > { %1278 = vmatprep.subr.msk.bf16.mxu0 %vm218_vm2, %v420_v27  ;;  %v432_v31 = vsel %vm218_vm2, %v421_v28, 0  ;;  %v1263_v27 = vld [vmem:[%s1761_s0 + $0x1c] sm:$0xf] }
  0x9e   : > { %v519_v32 = vpop.permute.xlu0 %518  ;;  %v521_v33 = vpop.permute.xlu1 %520 }
  0x9f   : > { %v527_v36 = vsel %vm526_vm5, %v519_v32, %v521_v33 }
  0xa0   : > { %1276 = vmatmul.mubr.msk.bf16.vlgmr.msra.gmra.mrb[4].mxu0 %vm214_vm3, %v170_v29  ;;  %1330 = vmatmul.mubr.msk.bf16.vlgmr.msra.gmra.mrb[4].mxu1 %vm214_vm3, %v170_v29  ;;  %v534_v40 = vsel %vm218_vm2, %v527_v36, 0 }
  0xa1   : > { %435 = vmatpush1.bf16.msra.mxu0 %v426_v30  ;;  %1334 = vmatpush3.bf16.msra.mxu1 %v432_v31  ;;  %v1264_v30 = vld [vmem:[%s1761_s0 + $0x20] sm:$0xf] }
  0xa2   : > { %v523_v34 = vpop.permute.xlu0 %522  ;;  %v525_v35 = vpop.permute.xlu1 %524  ;;  %466 = vmatprep.mubr.bf16.mxu0 %v1498_v1  ;;  %1335 = vmatprep.mubr.msk.bf16.mxu1 %vm1499_vm0, %v1497_v0 }
  0xa3   : > { %v528_v37 = vsel %vm526_vm5, %v521_v33, %v523_v34  ;;  %v529_v38 = vsel %vm526_vm5, %v523_v34, %v525_v35  ;;  %1339 = vmatprep.subr.bf16.mxu1 %v1497_v0 }
  0xa4   : > { %1281 = vmatprep.subr.msk.bf16.mxu0 %vm218_vm2, %v528_v37  ;;  %v540_v41 = vsel %vm218_vm2, %v529_v38, 0 }
  0xa6   : > { %v627_v42 = vpop.permute.xlu0 %626  ;;  %v629_v43 = vpop.permute.xlu1 %628 }
  0xa7   : > { %v635_v46 = vsel %vm634_vm6, %v627_v42, %v629_v43 }
  0xa8   : > { %1279 = vmatmul.mubr.msk.bf16.vlgmr.msra.gmra.mrb[8].mxu0 %vm214_vm3, %v1258_v39  ;;  %1336 = vmatmul.mubr.msk.bf16.vlgmr.msra.gmra.mrb[8].mxu1 %vm214_vm3, %v1258_v39  ;;  %v642_v50 = vsel %vm218_vm2, %v635_v46, 0 }
  0xa9   : > { %543 = vmatpush1.bf16.msra.mxu0 %v534_v40  ;;  %1340 = vmatpush3.bf16.msra.mxu1 %v540_v41 }
  0xaa   : > { %v631_v44 = vpop.permute.xlu0 %630  ;;  %v633_v45 = vpop.permute.xlu1 %632  ;;  %574 = vmatprep.mubr.bf16.mxu0 %v1498_v1  ;;  %1341 = vmatprep.mubr.msk.bf16.mxu1 %vm1499_vm0, %v1497_v0 }
  0xab   : > { %v636_v47 = vsel %vm634_vm6, %v629_v43, %v631_v44  ;;  %v637_v48 = vsel %vm634_vm6, %v631_v44, %v633_v45  ;;  %1345 = vmatprep.subr.bf16.mxu1 %v1497_v0 }
  0xac   : > { %1284 = vmatprep.subr.msk.bf16.mxu0 %vm218_vm2, %v636_v47  ;;  %v648_v51 = vsel %vm218_vm2, %v637_v48, 0 }
  0xae   : > { %v735_v52 = vpop.permute.xlu0 %734  ;;  %v737_v53 = vpop.permute.xlu1 %736 }
  0xaf   : > { %v743_v56 = vsel %vm742_vm7, %v735_v52, %v737_v53 }
  0xb0   : > { %1282 = vmatmul.mubr.msk.bf16.vlgmr.msra.gmra.mrb[12].mxu0 %vm214_vm3, %v1259_v49  ;;  %1342 = vmatmul.mubr.msk.bf16.vlgmr.msra.gmra.mrb[12].mxu1 %vm214_vm3, %v1259_v49  ;;  %v750_v60 = vsel %vm218_vm2, %v743_v56, 0 }
  0xb1   : > { %651 = vmatpush1.bf16.msra.mxu0 %v642_v50  ;;  %1346 = vmatpush3.bf16.msra.mxu1 %v648_v51 }
  0xb2   : > { %v739_v54 = vpop.permute.xlu0 %738  ;;  %v741_v55 = vpop.permute.xlu1 %740  ;;  %682 = vmatprep.mubr.bf16.mxu0 %v1498_v1  ;;  %1347 = vmatprep.mubr.msk.bf16.mxu1 %vm1499_vm0, %v1497_v0 }
  0xb3   : > { %v744_v57 = vsel %vm742_vm7, %v737_v53, %v739_v54  ;;  %v745_v58 = vsel %vm742_vm7, %v739_v54, %v741_v55  ;;  %1351 = vmatprep.subr.bf16.mxu1 %v1497_v0 }
  0xb4   : > { %1287 = vmatprep.subr.msk.bf16.mxu0 %vm218_vm2, %v744_v57  ;;  %v756_v61 = vsel %vm218_vm2, %v745_v58, 0 }
  0xb6   : > { %v843_v62 = vpop.permute.xlu0 %842  ;;  %v845_v63 = vpop.permute.xlu1 %844 }
  0xb7   : > { %v851_v4 = vsel %vm850_vm8, %v843_v62, %v845_v63 }
  0xb8   : > { %1285 = vmatmul.mubr.msk.bf16.vlgmr.msra.gmra.mrb[16].mxu0 %vm214_vm3, %v1260_v59  ;;  %1348 = vmatmul.mubr.msk.bf16.vlgmr.msra.gmra.mrb[16].mxu1 %vm214_vm3, %v1260_v59  ;;  %v858_v8 = vsel %vm218_vm2, %v851_v4, 0 }
  0xb9   : > { %759 = vmatpush1.bf16.msra.mxu0 %v750_v60  ;;  %1352 = vmatpush3.bf16.msra.mxu1 %v756_v61 }
  0xba   : > { %v847_v2 = vpop.permute.xlu0 %846  ;;  %v849_v3 = vpop.permute.xlu1 %848  ;;  %790 = vmatprep.mubr.bf16.mxu0 %v1498_v1  ;;  %1353 = vmatprep.mubr.msk.bf16.mxu1 %vm1499_vm0, %v1497_v0 }
  0xbb   : > { %v852_v5 = vsel %vm850_vm8, %v845_v63, %v847_v2  ;;  %v853_v6 = vsel %vm850_vm8, %v847_v2, %v849_v3  ;;  %1357 = vmatprep.subr.bf16.mxu1 %v1497_v0 }
  0xbc   : > { %1290 = vmatprep.subr.msk.bf16.mxu0 %vm218_vm2, %v852_v5  ;;  %v864_v9 = vsel %vm218_vm2, %v853_v6, 0 }
  0xbe   : > { %v951_v10 = vpop.permute.xlu0 %950  ;;  %v953_v11 = vpop.permute.xlu1 %952 }
  0xbf   : > { %v959_v14 = vsel %vm958_vm9, %v951_v10, %v953_v11 }
  0xc0   : > { %1288 = vmatmul.mubr.msk.bf16.vlgmr.msra.gmra.mrb[20].mxu0 %vm214_vm3, %v1261_v7  ;;  %1354 = vmatmul.mubr.msk.bf16.vlgmr.msra.gmra.mrb[20].mxu1 %vm214_vm3, %v1261_v7  ;;  %v966_v18 = vsel %vm218_vm2, %v959_v14, 0 }
  0xc1   : > { %867 = vmatpush1.bf16.msra.mxu0 %v858_v8  ;;  %1358 = vmatpush3.bf16.msra.mxu1 %v864_v9 }
  0xc2   : > { %v955_v12 = vpop.permute.xlu0 %954  ;;  %v957_v13 = vpop.permute.xlu1 %956  ;;  %898 = vmatprep.mubr.bf16.mxu0 %v1498_v1  ;;  %1359 = vmatprep.mubr.msk.bf16.mxu1 %vm1499_vm0, %v1497_v0 }
  0xc3   : > { %v960_v15 = vsel %vm958_vm9, %v953_v11, %v955_v12  ;;  %v961_v16 = vsel %vm958_vm9, %v955_v12, %v957_v13  ;;  %1363 = vmatprep.subr.bf16.mxu1 %v1497_v0 }
  0xc4   : > { %1293 = vmatprep.subr.msk.bf16.mxu0 %vm218_vm2, %v960_v15  ;;  %v972_v19 = vsel %vm218_vm2, %v961_v16, 0 }
  0xc6   : > { %v1059_v20 = vpop.permute.xlu0 %1058  ;;  %v1061_v21 = vpop.permute.xlu1 %1060 }
  0xc7   : > { %v1067_v24 = vsel %vm1066_vm10, %v1059_v20, %v1061_v21 }
  0xc8   : > { %1291 = vmatmul.mubr.msk.bf16.vlgmr.msra.gmra.mrb[24].mxu0 %vm214_vm3, %v1262_v17  ;;  %1360 = vmatmul.mubr.msk.bf16.vlgmr.msra.gmra.mrb[24].mxu1 %vm214_vm3, %v1262_v17  ;;  %v1074_v28 = vsel %vm218_vm2, %v1067_v24, 0 }
  0xc9   : > { %975 = vmatpush1.bf16.msra.mxu0 %v966_v18  ;;  %1364 = vmatpush3.bf16.msra.mxu1 %v972_v19 }
  0xca   : > { %v1063_v22 = vpop.permute.xlu0 %1062  ;;  %v1065_v23 = vpop.permute.xlu1 %1064  ;;  %1006 = vmatprep.mubr.bf16.mxu0 %v1498_v1  ;;  %1365 = vmatprep.mubr.msk.bf16.mxu1 %vm1499_vm0, %v1497_v0 }
  0xcb   : > { %v1068_v25 = vsel %vm1066_vm10, %v1061_v21, %v1063_v22  ;;  %v1069_v26 = vsel %vm1066_vm10, %v1063_v22, %v1065_v23  ;;  %1369 = vmatprep.subr.bf16.mxu1 %v1497_v0 }
  0xcc   : > { %1296 = vmatprep.subr.msk.bf16.mxu0 %vm218_vm2, %v1068_v25  ;;  %v1080_v29 = vsel %vm218_vm2, %v1069_v26, 0 }
  0xd0   : > { %1294 = vmatmul.mubr.msk.bf16.vlgmr.msra.gmra.mrb[28].mxu0 %vm214_vm3, %v1263_v27  ;;  %1366 = vmatmul.mubr.msk.bf16.vlgmr.msra.gmra.mrb[28].mxu1 %vm214_vm3, %v1263_v27 }
  0xd1   : > { %1083 = vmatpush1.bf16.msra.mxu0 %v1074_v28  ;;  %1370 = vmatpush3.bf16.msra.mxu1 %v1080_v29 }
  0xd2   : > { %1114 = vmatprep.mubr.bf16.mxu0 %v1498_v1  ;;  %1371 = vmatprep.mubr.msk.bf16.mxu1 %vm1499_vm0, %v1497_v0 }
  0xd8   : > { %1297 = vmatmul.mubr.msk.bf16.vlgmr.msra.gmra.mrb[32].mxu0 %vm214_vm3, %v1264_v30  ;;  %1372 = vmatmul.mubr.msk.bf16.vlgmr.msra.gmra.mrb[32].mxu1 %vm214_vm3, %v1264_v30 }
 0x16b   : > { %v262_v31 = vpop.f32.mrb[0].mxu0  ;;  %v303_v32 = vpop.f32.mrb[0].mxu1 }
 0x16c   : > { %v264_v33 = vpop.f32.mrb[1].mxu0  ;;  %v1325_v34 = vpop.f32.mrb[1].mxu1 }
 0x16d   : > { %v266_v35 = vpop.f32.mrb[2].mxu0  ;;  %v306_v36 = vpop.f32.mrb[2].mxu1 }
 0x16e   : > { %v267_v37 = vpop.f32.mrb[3].mxu0  ;;  %v1326_v38 = vpop.f32.mrb[3].mxu1 }
 0x173   : > { %v363_v1 = vpop.f32.mrb[4].mxu0  ;;  %v404_v39 = vpop.f32.mrb[4].mxu1 }
 0x174   : > { %v364_v40 = vadd.f32 %v363_v1, %v262_v31  ;;  %v405_v0 = vadd.f32 %v404_v39, %v303_v32  ;;  %v365_v41 = vpop.f32.mrb[5].mxu0  ;;  %v1331_v42 = vpop.f32.mrb[5].mxu1 }
 0x175   : > { %v366_v43 = vadd.f32 %v365_v41, %v264_v33  ;;  %v367_v44 = vpop.f32.mrb[6].mxu0  ;;  %v407_v45 = vpop.f32.mrb[6].mxu1 }
 0x176   : > { %v368_v46 = vpop.f32.mrb[7].mxu0  ;;  %v1332_v47 = vpop.f32.mrb[7].mxu1 }
 0x17b   : > { %v468_v48 = vpop.f32.mrb[8].mxu0  ;;  %v509_v49 = vpop.f32.mrb[8].mxu1 }
 0x17c   : > { %v515_v50 = vadd.f32 %v468_v48, %v364_v40  ;;  %v517_v51 = vadd.f32 %v509_v49, %v405_v0  ;;  %v470_v52 = vpop.f32.mrb[9].mxu0  ;;  %v1337_v53 = vpop.f32.mrb[9].mxu1 }
 0x17d   : > { %v516_v54 = vadd.f32 %v470_v52, %v366_v43  ;;  %v472_v55 = vpop.f32.mrb[10].mxu0  ;;  %v512_v56 = vpop.f32.mrb[10].mxu1 }
 0x17e   : > { %v473_v57 = vpop.f32.mrb[11].mxu0  ;;  %v1338_v58 = vpop.f32.mrb[11].mxu1 }
 0x183   : > { %v576_v59 = vpop.f32.mrb[12].mxu0  ;;  %v617_v60 = vpop.f32.mrb[12].mxu1 }
 0x184   : > { %v623_v61 = vadd.f32 %v576_v59, %v515_v50  ;;  %v625_v62 = vadd.f32 %v617_v60, %v517_v51  ;;  %v578_v63 = vpop.f32.mrb[13].mxu0  ;;  %v1343_v2 = vpop.f32.mrb[13].mxu1 }
 0x185   : > { %v624_v3 = vadd.f32 %v578_v63, %v516_v54  ;;  %v580_v4 = vpop.f32.mrb[14].mxu0  ;;  %v620_v5 = vpop.f32.mrb[14].mxu1 }
 0x186   : > { %v581_v6 = vpop.f32.mrb[15].mxu0  ;;  %v1344_v7 = vpop.f32.mrb[15].mxu1 }
 0x187   : > { %v1169_v50 = vpop.permute.xlu0 %1168 }
 0x18b   : > { %v684_v8 = vpop.f32.mrb[16].mxu0  ;;  %v725_v9 = vpop.f32.mrb[16].mxu1 }
 0x18c   : > { %v731_v10 = vadd.f32 %v684_v8, %v623_v61  ;;  %v733_v11 = vadd.f32 %v725_v9, %v625_v62  ;;  %v686_v12 = vpop.f32.mrb[17].mxu0  ;;  %v1349_v13 = vpop.f32.mrb[17].mxu1 }
 0x18d   : > { %v732_v14 = vadd.f32 %v686_v12, %v624_v3  ;;  %v688_v15 = vpop.f32.mrb[18].mxu0  ;;  %v728_v16 = vpop.f32.mrb[18].mxu1 }
 0x18e   : > { %v689_v17 = vpop.f32.mrb[19].mxu0  ;;  %v1350_v18 = vpop.f32.mrb[19].mxu1 }
 0x193   : > { %v792_v19 = vpop.f32.mrb[20].mxu0  ;;  %v833_v20 = vpop.f32.mrb[20].mxu1 }
 0x194   : > { %v839_v21 = vadd.f32 %v792_v19, %v731_v10  ;;  %v841_v22 = vadd.f32 %v833_v20, %v733_v11  ;;  %v794_v23 = vpop.f32.mrb[21].mxu0  ;;  %v1355_v24 = vpop.f32.mrb[21].mxu1 }
 0x195   : > { %v840_v25 = vadd.f32 %v794_v23, %v732_v14  ;;  %v796_v26 = vpop.f32.mrb[22].mxu0  ;;  %v836_v27 = vpop.f32.mrb[22].mxu1 }
 0x196   : > { %v797_v28 = vpop.f32.mrb[23].mxu0  ;;  %v1356_v29 = vpop.f32.mrb[23].mxu1 }
 0x19b   : > { %v900_v30 = vpop.f32.mrb[24].mxu0  ;;  %v941_v31 = vpop.f32.mrb[24].mxu1 }
 0x19c   : > { %v947_v32 = vadd.f32 %v900_v30, %v839_v21  ;;  %v949_v33 = vadd.f32 %v941_v31, %v841_v22  ;;  %v902_v34 = vpop.f32.mrb[25].mxu0  ;;  %v1361_v35 = vpop.f32.mrb[25].mxu1 }
 0x19d   : > { %v948_v36 = vadd.f32 %v902_v34, %v840_v25  ;;  %v904_v37 = vpop.f32.mrb[26].mxu0  ;;  %v944_v38 = vpop.f32.mrb[26].mxu1 }
 0x19e   : > { %v905_v1 = vpop.f32.mrb[27].mxu0  ;;  %v1362_v39 = vpop.f32.mrb[27].mxu1 }
 0x1a3   : > { %v1008_v40 = vpop.f32.mrb[28].mxu0  ;;  %v1049_v0 = vpop.f32.mrb[28].mxu1 }
 0x1a4   : > { %v1055_v41 = vadd.f32 %v1008_v40, %v947_v32  ;;  %v1057_v42 = vadd.f32 %v1049_v0, %v949_v33  ;;  %v1010_v43 = vpop.f32.mrb[29].mxu0  ;;  %v1367_v44 = vpop.f32.mrb[29].mxu1 }
 0x1a5   : > { %v1056_v45 = vadd.f32 %v1010_v43, %v948_v36  ;;  %v1012_v46 = vpop.f32.mrb[30].mxu0  ;;  %v1052_v47 = vpop.f32.mrb[30].mxu1 }
 0x1a6   : > { %v1013_v48 = vpop.f32.mrb[31].mxu0  ;;  %v1368_v49 = vpop.f32.mrb[31].mxu1 }
 0x1ab   : > { %v1116_v51 = vpop.f32.mrb[32].mxu0  ;;  %v1157_v52 = vpop.f32.mrb[32].mxu1 }
 0x1ac   : > { %v1163_v53 = vadd.f32 %v1116_v51, %v1055_v41  ;;  %v1165_v54 = vadd.f32 %v1157_v52, %v1057_v42  ;;  %v1118_v55 = vpop.f32.mrb[33].mxu0  ;;  %v1373_v56 = vpop.f32.mrb[33].mxu1 }
 0x1ad   : > { %v1164_v57 = vadd.f32 %v1118_v55, %v1056_v45  ;;  %v1120_v58 = vpop.f32.mrb[34].mxu0  ;;  %v1160_v59 = vpop.f32.mrb[34].mxu1 }
 0x1ae   : > { %v1171_v60 = vadd.f32 %v1169_v50, %v1163_v53  ;;  %v1173_v61 = vadd.f32 %v1169_v50, %v1165_v54  ;;  %v1121_v62 = vpop.f32.mrb[35].mxu0  ;;  %v1374_v63 = vpop.f32.mrb[35].mxu1 }
 0x1af   : > { %v1172_v2 = vadd.f32 %v1169_v50, %v1164_v57 }
 0x1b0   : > { %1174 = vst [vmem:[%s163_s24] sm:$0xff] %v1171_v60  ;;  %1176 = vst [vmem:[%s163_s24 + $0x10] sm:$0xff] %v1173_v61 }
 0x1b1   : > { %1175 = vst [vmem:[%s163_s24 + $0x8] sm:$0xff] %v1172_v2 }
 0x1b2   : > { %1446 = shalt.err (!%p1443_p3)
}
 0x1b3   : > { %s1447_s6 = scalar_lea.hbm %s1717_s16, 384  ;;  %s1451_s9 = scalar_lea.hbm %s1764_s3, 768 }
 0x1b4   : > { %p1448_p4 = scmp.ne.s32.totalorder %s1717_s16, %s1447_s6  ;;  %p1452_p9 = scmp.lt.u32.totalorder %s1717_s16, %s1764_s3 }
 0x1b5   : > { %p1453_p10 = scmp.lt.u32.totalorder %s1451_s9, %s1447_s6  ;;  %p1455_p12 = scmp.lt.u32.totalorder %s1447_s6, %s1717_s16 }
 0x1b6   : > { %p1449_p7 = pnand %p1448_p4, %p1567_p5 }
 0x1b7   : > { %p1454_p11 = por %p1453_p10, %p1452_p9 }
 0x1b8   : > { %p1450_p8 = pneg %p1449_p7 }
 0x1b9   : > { %p1456_p13 = por %p1455_p12, %p1454_p11 }
 0x1bb   : > { %p1457_p0 = pnand %p1456_p13, %p1450_p8 }
 0x1bd   : > { %1460 = shalt.err (!%p1457_p0)
}
 0x1be   : > { %1377 = dma.vmem_to_hbm [thread:$0]  (%p1567_p5), %s1719_s25, 384, %s1717_s16, %s1178_s28  }
 0x1bf PF: > { %p1383_p1 = scmp.ge.s32.totalorder %s1495_s15, 2  ;;  %s1204_s17 = sand.u32 1, %s1483_s12  }
 0x1c0   : > { %s1205_s19 = scalar_lea.sflag [#allocation3], %s1204_s17 }
 0x1c1   : > { %p1380_p2 = pnand %p1383_p1, %p1571_p6 }
 0x1c3   : > { %1478 = dma.done.wait (!%p1380_p2), %s1205_s19, 384  }
 0x1c4   : > { %1480 = vsyncadd (!%p1380_p2), %s1205_s19, 4294966912  ;;  %p13_p3 = scmp.ge.s32.totalorder %s1554_s18, 4   ;;  %s1767_s12 = smov %s1487_s13 }
 0x1c5   : > { %s1768_s13 = smov %s1491_s14  ;;  %s1769_s14 = smov %s1565_s21 }
 0x1c6   : > { %s1770_s15 = smov %s1554_s18  ;;  %15 = sbr.rel (!%p13_p3) target bundleno = 3 (0x3), region = 75 }
 0x1cd   :  { %1210 = vsyncpa [#allocation3], 1 }
 0x1ce   :  { %1212 = vsyncpa [#allocation3 + $0x1], 1 }

</bundles_post_ra>
